<compile_context>
chip_gen: v7x
topology: tpu7x:2x2x1
jax: 0.10.0
libtpu: 0.0.40
codegen_flags: <defaults>
</compile_context>

<pallas_src>
import jax
import jax.numpy as jnp
from jax.experimental import pallas as pl
from jax.experimental.pallas import tpu as pltpu


def _identity_kernel(x_ref, o_ref):
    # Pure pass-through of the current VMEM tile.
    o_ref[...] = x_ref[...]


_LANE = 128
# Widest lane (last) dim we will try: long unmasked vst streams, few big DMAs.
_MAX_WIDTH = 16384


def _sublane(dtype) -> int:
    # Native sublane packing: 4-byte -> 8, 2-byte -> 16, 1-byte -> 32.
    return max(8, 32 // jnp.dtype(dtype).itemsize)


def _vmem_budget():
    """Per-generation (block_bytes, vmem_limit_bytes)."""
    try:
        cap = int(pltpu.get_tpu_info().vmem_capacity_bytes)
    except Exception:
        cap = 64 * 1024 * 1024  # conservative: v7x per-TC VMEM
    # ~VMEM/8 per block: 16 MiB on v5e/v6e (128 MiB), 8 MiB on v7x (64 MiB).
    block_bytes = max(2 * 1024 * 1024, cap // 8)
    # 2 in + 2 out double buffers + headroom, never above physical VMEM.
    vmem_limit = min(cap, 4 * block_bytes + 8 * 1024 * 1024)
    return block_bytes, vmem_limit


def _copy_2d(x2d, rows, width, dtype):
    """Single-pass HBM->HBM copy of a (rows, width) slab via Pallas."""
    itemsize = jnp.dtype(dtype).itemsize
    sub = _sublane(dtype)
    block_bytes, vmem_limit = _vmem_budget()
    # Row-block from the VMEM byte budget, rounded to the sublane packing.
    tr = max(sub, (block_bytes // (width * itemsize)) // sub * sub)
    if tr >= rows:
        # Prefer >=2 grid steps so "parallel" can shard across both v7x TCs.
        half = -(-rows // 2)
        half = -(-half // sub) * sub
        tr = half if half < rows else rows  # tiny arrays: one full-extent block
    grid = (pl.cdiv(rows, tr),)  # partial tail block is masked by Pallas
    return pl.pallas_call(
        _identity_kernel,
        out_shape=jax.ShapeDtypeStruct((rows, width), dtype),
        grid_spec=pltpu.PrefetchScalarGridSpec(
            num_scalar_prefetch=0,
            grid=grid,
            in_specs=[pl.BlockSpec((tr, width), lambda i: (i, 0))],
            out_specs=pl.BlockSpec((tr, width), lambda i: (i, 0)),
        ),
        compiler_params=pltpu.CompilerParams(
            dimension_semantics=("parallel",),
            vmem_limit_bytes=vmem_limit,
        ),
        # NOTE: with a donated input, add input_output_aliases={0: 0} to
        # share the HBM buffer and skip the output allocation.
    )(x2d)


def _copy_1d(flat, n, dtype):
    """Single-pass copy of a ragged (non-128-divisible) flat array."""
    itemsize = jnp.dtype(dtype).itemsize
    sub = _sublane(dtype)
    chunk = sub * _LANE  # elements per natively-packed vreg tile
    block_bytes, vmem_limit = _vmem_budget()
    blk = max(chunk, (block_bytes // (chunk * itemsize)) * chunk)
    if blk >= n:
        blk = n  # full-extent block is always a legal block shape
    grid = (pl.cdiv(n, blk),)  # ragged tail block is masked by Pallas
    return pl.pallas_call(
        _identity_kernel,
        out_shape=jax.ShapeDtypeStruct((n,), dtype),
        grid_spec=pltpu.PrefetchScalarGridSpec(
            num_scalar_prefetch=0,
            grid=grid,
            in_specs=[pl.BlockSpec((blk,), lambda i: (i,))],
            out_specs=pl.BlockSpec((blk,), lambda i: (i,)),
        ),
        compiler_params=pltpu.CompilerParams(
            dimension_semantics=("parallel",),
            vmem_limit_bytes=vmem_limit,
        ),
    )(flat)


def identity(x, materialize=False):
    """Identity forward: returns a tensor equal to x (same shape, same dtype).

    materialize=False (default, matches nn.Identity semantics): return x
    itself — zero FLOPs, zero HBM traffic.
    materialize=True: produce an independent HBM buffer via a single-pass
    Pallas streaming copy (for callers that need fresh storage).
    """
    if not materialize:
        return x

    orig_shape = x.shape
    dtype = x.dtype
    n = x.size
    if n == 0:
        return x

    # Fast path: element count divisible by 128 (typical NCHW activations).
    # Reshape of contiguous data is free -> no extra HBM passes.
    if n % _LANE == 0:
        width = _LANE
        while width * 2 <= _MAX_WIDTH and n % (width * 2) == 0:
            width *= 2
        rows = n // width
        out2d = _copy_2d(x.reshape(rows, width), rows, width, dtype)
        return out2d.reshape(orig_shape)

    # Ragged fallback (rare): one masked 1-D pass, no pad / no slice.
    out1d = _copy_1d(jnp.ravel(x), n, dtype)
    return out1d.reshape(orig_shape)


if __name__ == "__main__":
    key = jax.random.PRNGKey(0)
    # Small NCHW input consistent with the module's docstring example.
    x = jax.random.normal(key, (2, 4, 16, 16), dtype=jnp.float32)

    # True-identity path (no copy): must be exactly the input.
    y0 = identity(x)
    assert y0 is x or bool(jnp.all(y0 == x))

    # Pallas copy path (fast, 128-divisible).
    y = identity(x, materialize=True)
    jax.block_until_ready(y)
    assert y.shape == x.shape, (y.shape, x.shape)
    assert y.dtype == x.dtype, (y.dtype, x.dtype)
    assert bool(jnp.all(y == x)), "Identity kernel output mismatch (2-D path)"

    # Pallas copy path (ragged, non-128-divisible) — single masked pass.
    xr = jax.random.normal(jax.random.PRNGKey(1), (3, 5, 7), dtype=jnp.float32)
    yr = identity(xr, materialize=True)
    jax.block_until_ready(yr)
    assert yr.shape == xr.shape and yr.dtype == xr.dtype
    assert bool(jnp.all(yr == xr)), "Identity kernel output mismatch (1-D path)"

    print("KERNEL_OK")
</pallas_src>

<mosaic_0001>
module attributes {stable_mosaic.version = 11 : i64} {
  func.func @_identity_kernel(%arg0: i32, %arg1: memref<1x2048xf32, #tpu.memory_space<vmem>>, %arg2: memref<1x2048xf32, #tpu.memory_space<vmem>>) attributes {dimension_semantics = [#tpu.dimension_semantics<parallel>], iteration_bounds = array<i64: 1>, scalar_prefetch = 0 : i64, scratch_operands = 0 : i64, tpu.core_type = #tpu.core_type<tc>, window_params = [{transform_indices = @transform_0, window_bounds = array<i64: 1, 2048>}, {transform_indices = @transform_1, window_bounds = array<i64: 1, 2048>}]} {
    %c0 = arith.constant 0 : index
    %c0_0 = arith.constant 0 : index
    %0 = vector.load %arg1[%c0, %c0_0] : memref<1x2048xf32, #tpu.memory_space<vmem>>, vector<1x2048xf32>
    %c0_1 = arith.constant 0 : index
    %c0_2 = arith.constant 0 : index
    %1 = vector.load %arg2[%c0_1, %c0_2] : memref<1x2048xf32, #tpu.memory_space<vmem>>, vector<1x2048xf32>
    tpu.vector_store %arg2[%c0_1, %c0_2], %0 {strides = array<i32>} : memref<1x2048xf32, #tpu.memory_space<vmem>>, vector<1x2048xf32>,
    return
  }
  func.func @transform_0(%arg0: i32) -> (i32, i32) {
    %c0_i32 = arith.constant 0 : i32
    %c0_i32_0 = arith.constant 0 : i32
    return %arg0, %c0_i32 : i32, i32
  }
  func.func @transform_1(%arg0: i32) -> (i32, i32) {
    %c0_i32 = arith.constant 0 : i32
    %c0_i32_0 = arith.constant 0 : i32
    return %arg0, %c0_i32 : i32, i32
  }
}

</mosaic_0001>

<bundles_post_ra>
// kernel: tpu_custom_call.1
= control target key start
LH: loop header
LB: loop body
LE: loop exit
PB: predicated region body
PF: predicated region fallthrough
CT: control target
= control target key end

     0   :  { %6 = vsyncpa [#allocation3], 0  ;;  %s126_s0 = inlined_call_operand.hbm [shape: f32[1,2048], index: 0, kind: input, shape index: {}]   ;;  %s127_s1 = inlined_call_operand.hbm [shape: f32[1,2048], index: 1, kind: output, shape index: {}]  }
   0x1   :  { %7 = vsyncpa [#allocation4], 0  ;;  %s90_s6 = smov [#allocation2]   ;;  %s42_s10 = scalar_lea.hbm %s126_s0, 256 }
   0x2   :  { %s14_s7 = sshll.u32 %s90_s6, 4  ;;  %p43_p0 = scmp.ne.s32.totalorder %s126_s0, %s42_s10  ;;  %s15_s7 = int_to_ptr.vmem [resolvable:$true] %s14_s7 }
   0x3   :  { %p46_p1 = scmp.lt.u32.totalorder %s42_s10, %s126_s0 }
   0x5   :  { %p48_p2 = pnand %p46_p1, %p43_p0 }
   0x7   :  { %51 = shalt.err (!%p48_p2)
}
   0x8   :  { %s52_s15 = scalar_lea.vmem %s15_s7, 256  ;;  %p57_p4 = scmp.lt.s32.totalorder %s15_s7, %s15_s7 }
   0x9   :  { %p53_p3 = scmp.ne.s32.totalorder %s15_s7, %s52_s15  ;;  %p58_p5 = scmp.lt.s32.totalorder %s52_s15, %s52_s15 }
   0xb   :  { %p59_p6 = por %p58_p5, %p57_p4 }
   0xd   :  { %p60_p7 = pnand %p59_p6, %p53_p3 }
   0xf   :  { %63 = shalt.err (!%p60_p7)
}
  0x10   :  { %17 = dma.hbm_to_vmem [thread:$0]  %s126_s0, 256, %s15_s7, [#allocation3]  }
  0x11   :  { %86 = dma.done.wait [#allocation3], 256  }
  0x12   :  { %87 = vsyncadd [#allocation3], 4294967040  ;;  %s91_s18 = smov [#allocation5]   ;;  %v21_v0 = vld [vmem:[#allocation2] sm:$0xff]  ;;  %v22_v1 = vld [vmem:[#allocation2 + $0x8] sm:$0xff] }
  0x13   :  { %s31_s19 = sshll.u32 %s91_s18, 4  ;;  %23 = vst [vmem:[#allocation5] sm:$0xff] %v21_v0  ;;  %24 = vst [vmem:[#allocation5 + $0x8] sm:$0xff] %v22_v1  ;;  %s32_s19 = int_to_ptr.vmem [resolvable:$true] %s31_s19 }
  0x14   :  { %s64_s20 = scalar_lea.vmem %s32_s19, 256  ;;  %p69_p9 = scmp.lt.s32.totalorder %s32_s19, %s32_s19 }
  0x15   :  { %p65_p8 = scmp.ne.s32.totalorder %s32_s19, %s64_s20  ;;  %p70_p10 = scmp.lt.s32.totalorder %s64_s20, %s64_s20 }
  0x17   :  { %p71_p11 = por %p70_p10, %p69_p9 }
  0x19   :  { %p72_p12 = pnand %p71_p11, %p65_p8 }
  0x1b   :  { %75 = shalt.err (!%p72_p12)
}
  0x1c   :  { %s76_s0 = scalar_lea.hbm %s127_s1, 256 }
  0x1d   :  { %p77_p13 = scmp.ne.s32.totalorder %s127_s1, %s76_s0  ;;  %p80_p0 = scmp.lt.u32.totalorder %s76_s0, %s127_s1 }
  0x1f   :  { %p82_p1 = pnand %p80_p0, %p77_p13 }
  0x21   :  { %85 = shalt.err (!%p82_p1)
}
  0x22   :  { %34 = dma.vmem_to_hbm [thread:$0]  %s32_s19, 256, %s127_s1, [#allocation4]  }
  0x23   :  { %88 = dma.done.wait [#allocation4], 256  }
  0x24   :  { %89 = vsyncadd [#allocation4], 4294967040 }
  0x25   :  { %38 = vsyncpa [#allocation3], 1 }
  0x26   :  { %39 = vsyncpa [#allocation4], 1 }

</bundles_post_ra>
